<compile_context>
chip_gen: v5e
topology: v5e:2x2
jax: 0.10.0
libtpu: 0.0.40
codegen_flags: <defaults>
</compile_context>

<pallas_src>
import functools

import jax
import jax.numpy as jnp
from jax.experimental import pallas as pl
from jax.experimental.pallas import tpu as pltpu

_LANE = 128


def _round_up(a, b):
    return (a + b - 1) // b * b


def _round_down(a, b):
    return (a // b) * b


def _conv_kernel(x_ref, xh_ref, w_ref, o_ref, *, dilation, compute_dtype):
    # x_ref : (C, TILE_T)   main time tile of x (elements [t*TILE_T, (t+1)*TILE_T))
    # xh_ref: (C, HALO_W)   head of the next time tile (halo for the shifted tap)
    # w_ref : (2, C_out, C) [tap0; tap1] weights, VMEM-resident (constant index map)
    # o_ref : (C_out, TILE_T)
    x0 = x_ref[...].astype(compute_dtype)            # (C, TILE_T)
    xh = xh_ref[...].astype(compute_dtype)           # (C, HALO_W)
    tile_t = x0.shape[-1]

    # Shifted tap: x1[:, j] = x[:, t*TILE_T + j + d]   (static slice of the concat)
    xcat = jnp.concatenate([x0, xh], axis=-1)         # (C, TILE_T + HALO_W)
    x1 = xcat[:, dilation:dilation + tile_t]          # (C, TILE_T)

    w0 = w_ref[0]                                     # (C_out, C)
    w1 = w_ref[1]                                     # (C_out, C)

    acc = jnp.dot(w0, x0, preferred_element_type=jnp.float32)
    acc = acc + jnp.dot(w1, x1, preferred_element_type=jnp.float32)
    o_ref[...] = acc.astype(o_ref.dtype)


def dilated_causal_conv1d(x, weight, dilation=1, *,
                          compute_dtype=jnp.bfloat16,
                          out_dtype=None,
                          max_tile_t=2048,
                          tile_vmem_budget_bytes=20 << 20):
    """x: (N, C, T), weight: (C_out, C_in, 2) -> (N, C_out, T - dilation)."""
    dilation = int(dilation)
    N, C, T = x.shape
    C_out, C_in, K = weight.shape
    assert K == 2 and C_in == C, "weight must be (C_out, C_in, 2)"
    assert dilation >= 1, "dilation must be >= 1"
    t_out = T - dilation
    assert t_out > 0, "input too short for this dilation"
    assert max_tile_t % _LANE == 0, "max_tile_t must be a multiple of 128"

    out_dtype = x.dtype if out_dtype is None else out_dtype
    in_b = jnp.dtype(x.dtype).itemsize
    out_b = jnp.dtype(out_dtype).itemsize
    cdt_b = jnp.dtype(compute_dtype).itemsize

    # Halo width: smallest 128-multiple covering the dilation offset.
    halo_w = _round_up(dilation, _LANE)
    unit = halo_w                                    # TILE_T must be a multiple of this

    # Time tile: largest unit-multiple that fits the (double-buffered) VMEM budget,
    # capped by max_tile_t and by the (rounded) output length.
    per_t = 2 * (C * in_b + C_out * out_b)           # double-buffered bytes per time column
    tile_cap = max(tile_vmem_budget_bytes // per_t, unit)
    tile_t = min(max(max_tile_t, unit), tile_cap, _round_up(t_out, unit))
    tile_t = max(_round_down(tile_t, unit), unit)

    nb = pl.cdiv(t_out, tile_t)                      # time blocks (last one mask-stored)
    r = tile_t // unit                               # halo blocks per time tile
    max_halo_idx = max(pl.cdiv(T, halo_w) - 1, 0)    # clamp: keep halo DMA origin in-bounds

    # Tiny weight reshape (C_out*C*2 elements) -> (2, C_out, C), compute dtype.
    w = jnp.moveaxis(weight, 2, 0).astype(compute_dtype)

    kernel = functools.partial(_conv_kernel, dilation=dilation,
                               compute_dtype=compute_dtype)

    # Grid: time-block axis first (long axis -> good megacore sharding on v7x), batch second.
    grid = (nb, N)

    in_specs = [
        # main time tile of x
        pl.BlockSpec((None, C, tile_t), lambda t, n: (n, 0, t)),
        # halo: head of the NEXT time tile; clamped so the block origin stays inside x
        # (clamped/garbage data only ever feeds masked output columns).
        pl.BlockSpec((None, C, halo_w),
                     lambda t, n: (n, 0, jnp.minimum((t + 1) * r, max_halo_idx))),
        # weights: constant index map -> DMA'd once, VMEM-resident across the grid
        pl.BlockSpec((2, C_out, C), lambda t, n: (0, 0, 0)),
    ]
    out_specs = pl.BlockSpec((None, C_out, tile_t), lambda t, n: (n, 0, t))

    # VMEM footprint estimate (double-buffered tiles + weights + in-kernel temporaries).
    tile_bytes = 2 * (C * tile_t * in_b + C * halo_w * in_b + C_out * tile_t * out_b)
    w_bytes = 2 * (2 * C_out * C * cdt_b)
    scratch_bytes = C * (2 * tile_t + halo_w) * cdt_b + C_out * tile_t * 4
    vmem_limit = int(min(max(tile_bytes + w_bytes + scratch_bytes + (4 << 20), 16 << 20),
                         48 << 20))

    flops = 2 * N * C_out * (2 * C) * t_out
    bytes_accessed = (N * C * T * in_b                      # main input reads
                      + N * nb * C * halo_w * in_b          # halo re-reads
                      + 2 * C_out * C * cdt_b               # weights
                      + N * C_out * t_out * out_b)          # output writes
    cost = pl.CostEstimate(flops=flops, transcendentals=0,
                           bytes_accessed=bytes_accessed)

    return pl.pallas_call(
        kernel,
        out_shape=jax.ShapeDtypeStruct((N, C_out, t_out), out_dtype),
        grid=grid,
        in_specs=in_specs,
        out_specs=out_specs,
        compiler_params=pltpu.CompilerParams(
            dimension_semantics=("parallel", "parallel"),
            vmem_limit_bytes=vmem_limit,
        ),
        cost_estimate=cost,
    )(x, x, w)


def _reference(x, weight, dilation):
    # Pure-JAX f32 reference: lax 1-D dilated conv, NCW layout, VALID padding.
    return jax.lax.conv_general_dilated(
        x, weight,
        window_strides=(1,),
        padding="VALID",
        rhs_dilation=(dilation,),
        dimension_numbers=("NCH", "OIH", "NCH"),
    )


if __name__ == "__main__":
    key = jax.random.PRNGKey(0)

    # --- primary check: module-sized shapes (N=2, C=4, T=16, dilation=2) ---
    k_x, k_w, k_x2, k_w2 = jax.random.split(key, 4)
    N, C, T, dilation = 2, 4, 16, 2
    x = jax.random.normal(k_x, (N, C, T), dtype=jnp.float32)
    weight = jax.random.normal(k_w, (C, C, 2), dtype=jnp.float32) * 0.1

    out = dilated_causal_conv1d(x, weight, dilation=dilation)
    out = jax.block_until_ready(out)
    ref = _reference(x, weight, dilation)
    assert out.shape == (N, C, T - dilation), out.shape
    # bf16 compute with f32 accumulation vs f32 reference -> loose tolerance
    assert jnp.allclose(out, ref, atol=2e-2, rtol=2e-2), "mismatch vs reference (small)"

    # --- secondary check: multiple time tiles + halo crossing + masked edge tile ---
    N2, C2, T2, d2 = 1, 8, 300, 2
    x2 = jax.random.normal(k_x2, (N2, C2, T2), dtype=jnp.float32)
    w2 = jax.random.normal(k_w2, (C2, C2, 2), dtype=jnp.float32) * 0.1
    out2 = dilated_causal_conv1d(x2, w2, dilation=d2, max_tile_t=128)
    out2 = jax.block_until_ready(out2)
    ref2 = _reference(x2, w2, d2)
    assert out2.shape == (N2, C2, T2 - d2), out2.shape
    assert jnp.allclose(out2, ref2, atol=2e-2, rtol=2e-2), "mismatch vs reference (tiled)"

    print("KERNEL_OK")
</pallas_src>

<mosaic_0001>
module attributes {stable_mosaic.version = 11 : i64} {
  func.func @_conv_kernel(%arg0: i32, %arg1: i32, %arg2: memref<1x4x128xf32, #tpu.memory_space<vmem>>, %arg3: memref<1x4x128xf32, #tpu.memory_space<vmem>>, %arg4: memref<2x4x4xbf16, #tpu.memory_space<vmem>>, %arg5: memref<1x4x128xf32, #tpu.memory_space<vmem>>) attributes {dimension_semantics = [#tpu.dimension_semantics<parallel>, #tpu.dimension_semantics<parallel>], iteration_bounds = array<i64: 1, 2>, scalar_prefetch = 0 : i64, scratch_operands = 0 : i64, tpu.core_type = #tpu.core_type<tc>, window_params = [{transform_indices = @transform_0, window_bounds = array<i64: 1, 4, 128>}, {transform_indices = @transform_1, window_bounds = array<i64: 1, 4, 128>}, {pipeline_mode = #tpu.pipeline_mode<synchronous>, transform_indices = @transform_2, window_bounds = array<i64: 2, 4, 4>}, {transform_indices = @transform_3, window_bounds = array<i64: 1, 4, 128>}]} {
    %c0 = arith.constant 0 : index
    %c0_0 = arith.constant 0 : index
    %c0_1 = arith.constant 0 : index
    %0 = vector.load %arg2[%c0, %c0_0, %c0_1] : memref<1x4x128xf32, #tpu.memory_space<vmem>>, vector<1x4x128xf32>
    %1 = vector.shape_cast %0 : vector<1x4x128xf32> to vector<4x128xf32>
    %2 = arith.truncf %1 : vector<4x128xf32> to vector<4x128xbf16>
    %c0_2 = arith.constant 0 : index
    %c0_3 = arith.constant 0 : index
    %c0_4 = arith.constant 0 : index
    %3 = vector.load %arg3[%c0_2, %c0_3, %c0_4] : memref<1x4x128xf32, #tpu.memory_space<vmem>>, vector<1x4x128xf32>
    %4 = vector.shape_cast %3 : vector<1x4x128xf32> to vector<4x128xf32>
    %5 = arith.truncf %4 : vector<4x128xf32> to vector<4x128xbf16>
    %6 = tpu.concatenate %2, %5 in 1 : vector<4x128xbf16>, vector<4x128xbf16> -> vector<4x256xbf16>
    %7 = vector.extract_strided_slice %6 {offsets = [0, 2], sizes = [4, 128], strides = [1, 1]} : vector<4x256xbf16> to vector<4x128xbf16>
    %c0_5 = arith.constant 0 : index
    %c0_6 = arith.constant 0 : index
    %c0_7 = arith.constant 0 : index
    %8 = vector.load %arg4[%c0_5, %c0_6, %c0_7] : memref<2x4x4xbf16, #tpu.memory_space<vmem>>, vector<1x4x4xbf16>
    %9 = vector.shape_cast %8 : vector<1x4x4xbf16> to vector<4x4xbf16>
    %c1 = arith.constant 1 : index
    %c0_8 = arith.constant 0 : index
    %c0_9 = arith.constant 0 : index
    %10 = vector.load %arg4[%c1, %c0_8, %c0_9] : memref<2x4x4xbf16, #tpu.memory_space<vmem>>, vector<1x4x4xbf16>
    %11 = vector.shape_cast %10 : vector<1x4x4xbf16> to vector<4x4xbf16>
    %cst = arith.constant dense<0.000000e+00> : vector<4x128xf32>
    %12 = tpu.matmul %9, %2, %cst {dimension_numbers = #tpu.dot_dimension_numbers<[1], [0], [0], [1], [0, 0, 1, 1], [], []>} : vector<4x4xbf16>, vector<4x128xbf16>, vector<4x128xf32> -> vector<4x128xf32>
    %cst_10 = arith.constant dense<0.000000e+00> : vector<4x128xf32>
    %13 = tpu.matmul %11, %7, %cst_10 {dimension_numbers = #tpu.dot_dimension_numbers<[1], [0], [0], [1], [0, 0, 1, 1], [], []>} : vector<4x4xbf16>, vector<4x128xbf16>, vector<4x128xf32> -> vector<4x128xf32>
    %14 = arith.addf %12, %13 : vector<4x128xf32>
    %c0_11 = arith.constant 0 : index
    %c0_12 = arith.constant 0 : index
    %c0_13 = arith.constant 0 : index
    %15 = vector.load %arg5[%c0_11, %c0_12, %c0_13] : memref<1x4x128xf32, #tpu.memory_space<vmem>>, vector<1x4x128xf32>
    %16 = vector.shape_cast %15 : vector<1x4x128xf32> to vector<4x128xf32>
    %17 = vector.shape_cast %14 : vector<4x128xf32> to vector<1x4x128xf32>
    tpu.vector_store %arg5[%c0_11, %c0_12, %c0_13], %17 {strides = array<i32>} : memref<1x4x128xf32, #tpu.memory_space<vmem>>, vector<1x4x128xf32>,
    return
  }
  func.func @transform_0(%arg0: i32, %arg1: i32) -> (i32, i32, i32) {
    %c0_i32 = arith.constant 0 : i32
    %c0_i32_0 = arith.constant 0 : i32
    return %arg1, %c0_i32, %arg0 : i32, i32, i32
  }
  func.func @transform_1(%arg0: i32, %arg1: i32) -> (i32, i32, i32) {
    %c1_i32 = arith.constant 1 : i32
    %0 = arith.addi %arg0, %c1_i32 : i32
    %c1_i32_0 = arith.constant 1 : i32
    %1 = arith.muli %0, %c1_i32_0 : i32
    %c0_i32 = arith.constant 0 : i32
    %2 = arith.minsi %1, %c0_i32 : i32
    %c0_i32_1 = arith.constant 0 : i32
    %c0_i32_2 = arith.constant 0 : i32
    return %arg1, %c0_i32_1, %2 : i32, i32, i32
  }
  func.func @transform_2(%arg0: i32, %arg1: i32) -> (i32, i32, i32) {
    %c0_i32 = arith.constant 0 : i32
    %c0_i32_0 = arith.constant 0 : i32
    %c0_i32_1 = arith.constant 0 : i32
    %c0_i32_2 = arith.constant 0 : i32
    return %c0_i32, %c0_i32_0, %c0_i32_1 : i32, i32, i32
  }
  func.func @transform_3(%arg0: i32, %arg1: i32) -> (i32, i32, i32) {
    %c0_i32 = arith.constant 0 : i32
    %c0_i32_0 = arith.constant 0 : i32
    return %arg1, %c0_i32, %arg0 : i32, i32, i32
  }
}

</mosaic_0001>

<bundles_post_ra>
// kernel: tpu_custom_call.1
= control target key start
LH: loop header
LB: loop body
LE: loop exit
PB: predicated region body
PF: predicated region fallthrough
CT: control target
= control target key end

     0   :  { %s926_s0 = inlined_call_operand.hbm [shape: f32[2,4,16], index: 0, kind: input, shape index: {}]   ;;  %s927_s1 = inlined_call_operand.hbm [shape: f32[2,4,16], index: 1, kind: input, shape index: {}]   ;;  %s928_s2 = inlined_call_operand.hbm [shape: bf16[2,4,4], index: 2, kind: input, shape index: {}]   ;;  %s929_s3 = inlined_call_operand.hbm [shape: f32[2,4,14], index: 3, kind: output, shape index: {}]  }
   0x1   :  { %932 = sst [smem:[#allocation16_spill]] %s928_s2 }
   0x2   :  { %8 = vsyncpa [#allocation3], 0 }
   0x3   :  { %10 = vsyncpa [#allocation3 + $0x1], 0 }
   0x4   :  { %11 = vsyncpa [#allocation6], 0 }
   0x5   :  { %13 = vsyncpa [#allocation6 + $0x1], 0 }
   0x6   :  { %14 = vsyncpa [#allocation4], 0 }
   0x7   :  { %16 = vsyncpa [#allocation4 + $0x1], 0  ;;  %s769_s12 = smov 0   ;;  %s771_s13 = smov 0  }
   0x8   :  { %s773_s14 = smov 0   ;;  %s775_s15 = smov 0  }
   0x9   :  { %s777_s16 = smov 0   ;;  %s779_s17 = smov 0  }
   0xa LB: > { %933 = sst [smem:[#allocation13_spill]] %s739_s16  ;;  %s800_s18 = sadd.s32 4294967295, %s743_s17   ;;  %s743_s17 = sphi %s779_s17, %s22_s17   ;;  %s739_s16 = sphi %s777_s16, %s944_s16   ;;  %s735_s15 = sphi %s775_s15, %s943_s15   ;;  %s731_s14 = sphi %s773_s14, %s947_s14   ;;  %s727_s13 = sphi %s771_s13, %s946_s13   ;;  %s723_s12 = sphi %s769_s12, %s945_s12  }
   0xb   : > { %p464_p0 = scmp.ge.s32.totalorder %s743_s17, 1  ;;  %p57_p1 = scmp.eq.s32.totalorder %s800_s18, 0 }
   0xc   : > { %p150_p2 = scmp.lt.s32.totalorder %s743_s17, 3  ;;  %s934_s2 = sld [smem:[#allocation16_spill]] }
   0xd   : > { %s745_s23 = smov [#allocation7]   ;;  %p466_p6 = scmp.ge.s32.totalorder %s743_s17, 2 }
   0xe   : > { %p808_p3 = pnand %p464_p0, %p150_p2  ;;  %s163_s24 = sshll.u32 %s745_s23, 4  ;;  %s164_s24 = int_to_ptr.vmem [resolvable:$true] %s163_s24 }
   0xf   : > { %s746_s25 = smov 32   ;;  %s747_s26 = smov 2  }
  0x10   : > { %p492_p4 = pneg %p808_p3  ;;  %s463_s27 = sadd.s32 4294967294, %s743_s17  }
  0x11   : > { %s31_s28 = sadd.s32 1, %s739_s16  ;;  %s43_s29 = sadd.s32 1, %s731_s14 }
  0x12   : > { %s161_s21 = sshll.u32 %s934_s2, 4  ;;  %p493_p5 = pnand %p492_p4, %p57_p1  ;;  %s162_s21 = int_to_ptr.hbm [resolvable:$true] %s161_s21 }
  0x13   : > { %p32_p7 = scmp.ge.s32.totalorder %s31_s28, 2  ;;  %p50_p8 = scmp.ne.s32.totalorder %s731_s14, %s727_s13 }
  0x14   : > { %495 = dma.hbm_to_vmem [thread:$0]  (!%p493_p5), %s162_s21, 64, %s164_s24, [#allocation6], %s746_s25, %s746_s25, %s747_s26  }
  0x15   : > { %p51_p9 = scmp.eq.s32.totalorder %s743_s17, 0  ;;  %p56_p10 = scmp.ne.s32.totalorder %s727_s13, %s723_s12 }
  0x16   : > { %s949_s28 = smov (%p32_p7, %s31_s28), 0  ;;  %p137_p13 = scmp.eq.s32.totalorder %s800_s18, 1 }
  0x17   : > { %936 = sst [smem:[#allocation14_spill]] %s949_s28  ;;  %p827_p11 = por %p51_p9, %p50_p8 }
  0x18   : > { %p833_p12 = por %p57_p1, %p56_p10  ;;  %s38_s5 = ssub.s32 %s739_s16, %s949_s28 }
  0x19   : > { %p41_p0 = scmp.eq.s32.totalorder %s38_s5, 0  ;;  %p143_p2 = scmp.eq.s32.totalorder %s463_s27, 1 }
  0x1a   : > { %p840_p4 = por %p137_p13, %p50_p8  ;;  %p508_p5 = scmp.lt.s32.totalorder %s743_s17, 2 }
  0x1b   : > { %s846_s7 = scalar_select %p41_p0, %s731_s14, %s43_s29  }
  0x1c   : > { %p848_p7 = por %p143_p2, %p56_p10  ;;  %s177_s9 = sand.u32 1, %s731_s14  }
  0x1d   : > { %940 = sst [smem:[#allocation15_spill]] %s846_s7  ;;  %s467_s10 = sshll.u32 %s177_s9, 2 }
  0x1e   : > { %s468_s11 = sshll.u32 %s739_s16, 2  ;;  %s181_s23 = scalar_lea.vmem [#allocation2], %s467_s10 }
  0x1f   : > { %s186_s21 = scalar_lea.hbm %s926_s0, %s468_s11  ;;  %s190_s24 = sshll.u32 %s181_s23, 4  ;;  %s191_s24 = int_to_ptr.vmem [resolvable:$true] %s190_s24 }
  0x20   : > { %s188_s25 = sshll.u32 %s186_s21, 4  ;;  %p497_p8 = pnand %p508_p5, %p827_p11  ;;  %s189_s25 = int_to_ptr.hbm [resolvable:$true] %s188_s25 }
  0x21   : > { %s209_s29 = scalar_lea.hbm %s927_s1, %s468_s11  ;;  %s197_s5 = sand.u32 1, %s743_s17  }
  0x22   : > { %s178_s2 = scalar_lea.sflag [#allocation3], %s177_s9  ;;  %s211_s28 = sshll.u32 %s209_s29, 4  ;;  %s212_s28 = int_to_ptr.hbm [resolvable:$true] %s211_s28 }
  0x23   : > { %499 = dma.hbm_to_vmem [thread:$0]  (!%p497_p8), %s189_s25, 64, %s191_s24, %s178_s2  }
  0x24   : > { %s201_s16 = scalar_lea.vmem [#allocation5], %s467_s10  ;;  %s198_s19 = scalar_lea.sflag [#allocation6], %s197_s5 }
  0x25   : > { %s213_s7 = sshll.u32 %s201_s16, 4  ;;  %222 = sbr.rel (%p808_p3) target bundleno = 313 (0x139), region = 32  ;;  %s214_s7 = int_to_ptr.vmem [resolvable:$true] %s213_s7 }
  0x26   : > { %502 = dma.hbm_to_vmem [thread:$0]  (!%p497_p8), %s212_s28, 64, %s214_s7, %s198_s19  }
  0x27   : > { %s866_s30 = sand.u32 (!%p808_p3), 1, %s727_s13  }
  0x28   : > { %s869_s11 = sshll.u32 (!%p808_p3), %s866_s30, 2  ;;  %s225_s2 = scalar_lea.sflag (!%p808_p3), [#allocation3], %s866_s30 }
  0x29   : > { %s228_s9 = scalar_lea.vmem (!%p808_p3), [#allocation2], %s869_s11 }
  0x2a   : > { %706 = dma.done.wait (%p833_p12), %s225_s2, 64  }
  0x2b   : > { %708 = vsyncadd (%p833_p12), %s225_s2, 4294967232  ;;  %s234_s16 = sand.u32 1, %s800_s18   ;;  %s238_s28 = scalar_lea.vmem [#allocation5], %s869_s11 }
  0x2c   : > { %s235_s22 = scalar_lea.sflag [#allocation6], %s234_s16 }
  0x2d   : > { %710 = dma.done.wait (%p833_p12), %s235_s22, 64  }
  0x2e   : > { %712 = vsyncadd (%p833_p12), %s235_s22, 4294967232 }
  0x2f   : > { %714 = dma.done.wait (%p57_p1), [#allocation6], 64  }
  0x30   : > { %716 = vsyncadd (%p57_p1), [#allocation6], 4294967232  ;;  %v276_v0 = vld [vmem:[%s228_s9] sm:$0xf]  ;;  %s748_s7 = smov 126   ;;  %vm295_vm0 = vcmask 1041408  }
  0x31   : > { %v277_v1 = vpack.c.bf16 %v276_v0, %v276_v0  ;;  %v278_v2 = vld [vmem:[%s238_s28] sm:$0xf]  ;;  %v280_v5 = vld [vmem:[#allocation7] sm:$0x3]  ;;  %vm291_vm1 = vcmask 31744   ;;  %vm289_vm2 = vcmask 1031168  }
  0x32   : > { %v279_v3 = vpack.c.bf16 %v278_v2, %v278_v2  ;;  %v282_v10 = vld [vmem:[#allocation7 + $0x2] sm:$0x3]  ;;  %s479_s18 = sshll.u32 %s735_s15, 2  ;;  %s271_s21 = scalar_lea.vmem [#allocation8], %s869_s11 }
  0x33   : > { %285 = vrot.lane.b32.xlu0 %v277_v1, %s748_s7  ;;  %v316_v4 = vsel %vm295_vm0, %v277_v1, 0  ;;  %s344_s20 = scalar_lea.hbm %s929_s3, %s479_s18  ;;  %s346_s23 = sshll.u32 %s271_s21, 4  ;;  %s347_s23 = int_to_ptr.vmem [resolvable:$true] %s346_s23 }
  0x34   : > { %325 = vmatpush.bf16.msra.mxu1 %v316_v4  ;;  %s348_s24 = sshll.u32 %s344_s20, 4  ;;  %s333_s25 = scalar_lea.sflag [#allocation4], %s866_s30  ;;  %s349_s24 = int_to_ptr.hbm [resolvable:$true] %s348_s24 }
  0x35   : > { %s667_s26 = sshra.s32 %s349_s24, 4  ;;  %s673_s5 = scalar_lea.hbm %s929_s3, 8  ;;  %s668_s26 = int_to_ptr.hbm [resolvable:$true] %s667_s26 }
  0x36   : > { %s669_s27 = scalar_lea.hbm %s668_s26, 4  ;;  %p674_p10 = scmp.lt.s32.totalorder %s668_s26, %s929_s3 }
  0x37   : > { %477 = vmatmul.msk.bf16.vlgmr.msra.gmra.mxu1 %vm291_vm1, %v280_v5  ;;  %p670_p1 = scmp.ne.s32.totalorder %s668_s26, %s669_s27  ;;  %p675_p11 = scmp.lt.s32.totalorder %s673_s5, %s669_s27 }
  0x39   : > { %p671_p3 = pnand %p670_p1, %p840_p4  ;;  %p676_p12 = por %p675_p11, %p674_p10 }
  0x3b   : > { %287 = vrot.lane.b32.xlu0 %v279_v3, %s748_s7  ;;  %p672_p9 = pneg %p671_p3 }
  0x3d   : > { %p677_p13 = pnand %p676_p12, %p672_p9 }
  0xa5   : > { %v286_v6 = vpop.permute.xlu0 %285 }
  0xad   : > { %v288_v7 = vpop.permute.xlu0 %287 }
  0xae   : > { %v290_v8 = vsel %vm289_vm2, %v286_v6, %v288_v7 }
  0xaf   : > { %v297_v9 = vsel %vm295_vm0, %v290_v8, 0 }
  0xb0   : > { %306 = vmatpush.bf16.msra.mxu0 %v297_v9 }
  0xb3   : > { %476 = vmatmul.msk.bf16.vlgmr.msra.gmra.mxu0 %vm291_vm1, %v282_v10 }
  0xb4   : > { %v327_v11 = vpop.f32.mrf.mxu1 }
  0xbc   : > { %v329_v12 = vpop.f32.mrf.mxu1 }
 0x130   : > { %v308_v13 = vpop.f32.mrf.mxu0 }
 0x131   : > { %v328_v14 = vadd.f32 %v327_v11, %v308_v13 }
 0x133   : > { %331 = vst [vmem:[%s271_s21] sm:$0xf] %v328_v14 }
 0x134   : > { %680 = shalt.err (!%p677_p13)
}
 0x135   : > { %490 = dma.vmem_to_hbm [thread:$0]  (%p840_p4), %s347_s23, 64, %s349_s24, %s333_s25  }
 0x138   : > { %v310_v15 = vpop.f32.mrf.mxu0 }
 0x139 PF: > { %s360_s30 = sand.u32 1, %s723_s12   ;;  %p504_p0 = pnand %p466_p6, %p848_p7 }
 0x13a   : > { %s361_s2 = scalar_lea.sflag [#allocation4], %s360_s30 }
 0x13b   : > { %p505_p2 = pneg %p504_p0 }
 0x13d   : > { %718 = dma.done.wait (%p505_p2), %s361_s2, 64  }
 0x13e   : > { %720 = vsyncadd (%p505_p2), %s361_s2, 4294967232  ;;  %s22_s17 = sadd.s32 1, %s743_s17   ;;  %s942_s6 = sld [smem:[#allocation15_spill]] }
 0x13f   : > { %p19_p5 = scmp.ge.s32.totalorder %s22_s17, 4   ;;  %s943_s15 = sld [smem:[#allocation13_spill]] }
 0x140   : > { %s944_s16 = sld [smem:[#allocation14_spill]]  ;;  %s945_s12 = smov %s727_s13 }
 0x141   : > { %s946_s13 = smov %s731_s14  ;;  %21 = sbr.rel (!%p19_p5) target bundleno = 10 (0xa), region = 95 }
 0x144   : > { %s947_s14 = smov %s942_s6 }
 0x146   :  { %367 = vsyncpa [#allocation3], 1 }
 0x147   :  { %369 = vsyncpa [#allocation3 + $0x1], 1 }
 0x148   :  { %370 = vsyncpa [#allocation6], 1 }
 0x149   :  { %372 = vsyncpa [#allocation6 + $0x1], 1 }
 0x14a   :  { %373 = vsyncpa [#allocation4], 1 }
 0x14b   :  { %375 = vsyncpa [#allocation4 + $0x1], 1 }

</bundles_post_ra>
